<compile_context>
chip_gen: v6e
topology: v6e:2x2x1
jax: 0.10.0
libtpu: 0.0.40
codegen_flags: <defaults>
</compile_context>

<pallas_src>
import jax
import jax.numpy as jnp
import numpy as np
from jax import lax
from jax.experimental import pallas as pl
from jax.experimental.pallas import tpu as pltpu

_EPS = 1e-12  # F.normalize default eps


def _probe_kernel(x_ref, cn_ref, probs_ref, loss_ref=None):
    """One (batch, pixel-tile) grid step.

    x_ref:     (C, TP)  channels-first feature tile, native dtype (f32/bf16)
    cn_ref:    (N, C)   pre-normalized clusters (resident, constant index_map)
    probs_ref: (N, TP)  one-hot cluster assignment (lane-dense stores)
    loss_ref:  (1, L)   training only: per-lane partial sums over this tile of
                        the per-pixel max *normalized* inner product
                        (L = 128 normally; == TP for a single sub-128 tile)
    """
    x = x_ref[...]            # keep native dtype: bf16 inputs feed the MXU as bf16
    cn = cn_ref[...]

    # einsum('bchw,nc->bnhw') == [N, C] @ [C, TP] in this layout.  No feature
    # normalization here: argmax/one-hot is invariant under the positive
    # per-pixel scale 1/||x||, so the (C, TP) normalized intermediate (the old
    # register-pressure / spill source) never needs to exist.
    inner = jnp.dot(cn, x, preferred_element_type=jnp.float32)     # (N, TP) f32

    max_val = jnp.max(inner, axis=0, keepdims=True)                # (1, TP)
    n = inner.shape[0]
    iota = lax.broadcasted_iota(jnp.int32, inner.shape, 0)
    # first-occurrence tie-break, matching torch.argmax
    first_idx = jnp.min(jnp.where(inner >= max_val, iota, n),
                        axis=0, keepdims=True)
    probs_ref[...] = (iota == first_idx).astype(probs_ref.dtype)

    if loss_ref is not None:
        # The loss needs the *normalized* max inner product; apply the
        # per-pixel scale to the (1, TP) max only.  F.normalize eps semantics:
        # x * rsqrt(max(||x||^2, eps^2)) == x / max(||x||, eps).
        xf = x.astype(jnp.float32)
        sumsq = jnp.sum(xf * xf, axis=0, keepdims=True)            # (1, TP)
        inv_norm = lax.rsqrt(jnp.maximum(sumsq, _EPS * _EPS))      # EUP slot
        max_scaled = max_val * inv_norm                            # (1, TP)

        # Fold TP -> L lanes with vreg-aligned static slices (pure VALU adds)
        # so only (1, L) f32 per tile reaches HBM instead of (1, TP).
        tp = max_scaled.shape[-1]
        l = loss_ref.shape[-1]
        part = max_scaled[:, :l]
        for j in range(1, tp // l):
            part = part + max_scaled[:, j * l:(j + 1) * l]
        loss_ref[...] = part


def _vmem_capacity_bytes():
    try:
        cap = getattr(pltpu.get_tpu_info(), "vmem_capacity_bytes", None)
        if cap:
            return int(cap)
    except Exception:
        pass
    return 64 << 20  # conservative fallback (v7x per-TensorCore physical VMEM)


def _pick_tile_p(hw, batch, requested, bytes_per_pixel, vmem_cap):
    """Largest multiple-of-128 divisor of hw that fits the VMEM budget, keeps
    >= 2 total grid steps (v7x has 2 TensorCores), and is <= `requested`."""
    if hw <= 128 or hw % 128 != 0:
        return hw               # single full-row tile; block dim == array dim is legal
    budget = vmem_cap // 3      # double-buffered blocks must leave plenty of headroom
    cap = min(requested, hw, max(128, budget // max(bytes_per_pixel, 1)))
    if batch == 1 and hw >= 256:
        cap = min(cap, hw // 2)  # guarantee >= 2 grid steps when B == 1
    cap = max(128, (cap // 128) * 128)
    t = cap
    while t >= 128:
        if hw % t == 0:
            return t
        t -= 128
    return hw


def cluster_probe_forward(image, clusters, *, training=False, tile_p=4096,
                          probs_dtype=jnp.bfloat16):
    """ClusterProbe.forward with net = identity (code == image).

    image:    (B, C, H, W)  float (f32 or bf16)
    clusters: (N, C)        float  (the nn.Parameter)

    Returns (cluster_probs, code) in eval mode and
            (cluster_loss, cluster_probs, code) in training mode.
    One-hot values are exact in bf16; pass probs_dtype=jnp.float32 to match
    the PyTorch `.to(torch.float32)` dtype at 2x the HBM write traffic.
    """
    code = image  # self.net(image) with identity net; semantic_feature_position=-1
    B, C, H, W = code.shape
    N = clusters.shape[0]
    HW = H * W

    in_bytes = np.dtype(code.dtype).itemsize
    probs_bytes = np.dtype(probs_dtype).itemsize
    vmem_cap = _vmem_capacity_bytes()

    # Per-pixel VMEM bytes: double-buffered in/out blocks + rough headroom for
    # the (N, TP) matmul / argmax intermediates inside the kernel.
    bytes_per_pixel = 2 * (C * in_bytes + N * probs_bytes) + 4 * (6 * N + C + 8)
    tile_p = _pick_tile_p(HW, B, min(tile_p, HW), bytes_per_pixel, vmem_cap)
    n_tiles = HW // tile_p

    # Hoist F.normalize(clusters, dim=1) out of the kernel (tiny, done once);
    # cast to the image dtype so bf16 inputs hit the MXU's native bf16 path.
    clusters_f32 = clusters.astype(jnp.float32)
    cn = clusters_f32 / jnp.maximum(
        jnp.linalg.norm(clusters_f32, axis=1, keepdims=True), _EPS)
    if code.dtype == jnp.bfloat16:
        cn = cn.astype(jnp.bfloat16)

    # Channels-first [B, C, HW] view: free reshape, no transpose, no upcast.
    x = code.reshape(B, C, HW)

    x_spec = pl.BlockSpec((pl.Squeezed(), C, tile_p), lambda b, i: (b, 0, i))
    # The resident (N, C) cluster block is tiny; single-buffering it would only
    # save N*C*itemsize bytes, so the default pipelining is kept.
    cn_spec = pl.BlockSpec((N, C), lambda b, i: (0, 0))
    probs_spec = pl.BlockSpec((pl.Squeezed(), N, tile_p), lambda b, i: (b, 0, i))

    out_shape = [jax.ShapeDtypeStruct((B, N, HW), probs_dtype)]
    out_specs = [probs_spec]
    if training:
        lanes = 128 if tile_p % 128 == 0 else tile_p
        out_shape.append(
            jax.ShapeDtypeStruct((B, 1, n_tiles * lanes), jnp.float32))
        out_specs.append(
            pl.BlockSpec((pl.Squeezed(), 1, lanes), lambda b, i: (b, 0, i)))

    # Explicit VMEM limit (v5e's default scoped limit is only 16 MiB): sized
    # from the double-buffered blocks + resident clusters + intermediates,
    # clamped below physical capacity (v7x: 64 MiB).
    block_bytes = 2 * (C * tile_p * in_bytes + N * tile_p * probs_bytes + 128 * 4)
    interm_bytes = (6 * N + C + 8) * tile_p * 4
    vmem_limit = block_bytes + 2 * N * C * 4 + interm_bytes + (4 << 20)
    vmem_limit = int(min(max(vmem_limit, 32 << 20), int(0.9 * vmem_cap)))

    outs = pl.pallas_call(
        _probe_kernel,
        out_shape=tuple(out_shape),
        grid_spec=pltpu.PrefetchScalarGridSpec(
            num_scalar_prefetch=0,
            grid=(B, n_tiles),
            in_specs=[x_spec, cn_spec],
            out_specs=tuple(out_specs)),
        compiler_params=pltpu.CompilerParams(
            dimension_semantics=("parallel", "parallel"),
            vmem_limit_bytes=vmem_limit),
    )(x, cn)

    cluster_probs = outs[0].reshape(B, N, H, W)   # free reshape, no transpose

    # resize_to(cluster_probs, image): the identity "net" preserves H, W, so
    # the resize is a no-op here.
    # TODO(synk): a real downsampling backbone would need a bilinear resize.
    if training:
        # outs[1] holds per-tile lane-partial sums of max_n(normalized inner);
        # -(probs*inner).sum(1).mean() == -mean of that per-pixel max.
        cluster_loss = -jnp.sum(outs[1]) / (B * HW)
        return cluster_loss, cluster_probs, code
    return cluster_probs, code


def _reference_forward(image, clusters):
    """Pure-JAX reference mirroring the PyTorch math (eval mode)."""
    cn = clusters / jnp.maximum(
        jnp.linalg.norm(clusters, axis=1, keepdims=True), _EPS)
    fn = image / jnp.maximum(
        jnp.linalg.norm(image, axis=1, keepdims=True), _EPS)
    inner = jnp.einsum('bchw,nc->bnhw', fn, cn)
    probs = jax.nn.one_hot(jnp.argmax(inner, axis=1), clusters.shape[0],
                           axis=1, dtype=jnp.float32)
    return inner, probs


if __name__ == "__main__":
    B, C, H, W = 2, 32, 16, 16      # dim = C = 32
    num_classes = 8

    key = jax.random.PRNGKey(0)
    k_img, k_clus = jax.random.split(key)
    image = jax.random.normal(k_img, (B, C, H, W), dtype=jnp.float32)
    # deterministic stand-in for the nn.Parameter torch.randn(num_classes, dim)
    clusters = jax.random.normal(k_clus, (num_classes, C), dtype=jnp.float32)

    # eval path
    cluster_probs, code = cluster_probe_forward(image, clusters, training=False)
    jax.block_until_ready((cluster_probs, code))
    assert cluster_probs.shape == (B, num_classes, H, W)
    assert code.shape == (B, C, H, W)

    # training path
    loss, probs_tr, _ = cluster_probe_forward(image, clusters, training=True)
    jax.block_until_ready((loss, probs_tr))

    probs_f32 = np.asarray(cluster_probs.astype(jnp.float32))
    probs_tr_f32 = np.asarray(probs_tr.astype(jnp.float32))

    # correctness vs. pure-JAX reference (tie-robust argmax check)
    ref_inner, _ = _reference_forward(image, clusters)
    ref_inner = np.asarray(ref_inner)

    # each pixel is a valid one-hot vector
    np.testing.assert_allclose(probs_f32.sum(axis=1), 1.0, atol=0, rtol=0)
    # the selected cluster attains (within rounding) the max reference inner product
    selected = (probs_f32 * ref_inner).sum(axis=1)
    ref_max = ref_inner.max(axis=1)
    np.testing.assert_array_less(ref_max - selected, 1e-5)
    # training and eval paths agree on the assignment
    np.testing.assert_allclose(probs_tr_f32, probs_f32, atol=0, rtol=0)
    # loss matches the reference -(probs*inner).sum(1).mean() == -mean(max inner)
    ref_loss = -ref_max.mean()
    np.testing.assert_allclose(np.asarray(loss), ref_loss, rtol=1e-4, atol=1e-5)

    print("KERNEL_OK")
</pallas_src>

<mosaic_0001>
module attributes {stable_mosaic.version = 11 : i64} {
  func.func @_probe_kernel(%arg0: i32, %arg1: i32, %arg2: memref<1x32x256xf32, #tpu.memory_space<vmem>>, %arg3: memref<8x32xf32, #tpu.memory_space<vmem>>, %arg4: memref<1x8x256xbf16, #tpu.memory_space<vmem>>) attributes {dimension_semantics = [#tpu.dimension_semantics<parallel>, #tpu.dimension_semantics<parallel>], iteration_bounds = array<i64: 2, 1>, scalar_prefetch = 0 : i64, scratch_operands = 0 : i64, tpu.core_type = #tpu.core_type<tc>, window_params = [{transform_indices = @transform_0, window_bounds = array<i64: 1, 32, 256>}, {pipeline_mode = #tpu.pipeline_mode<synchronous>, transform_indices = @transform_1, window_bounds = array<i64: 8, 32>}, {transform_indices = @transform_2, window_bounds = array<i64: 1, 8, 256>}]} {
    %c0 = arith.constant 0 : index
    %c0_0 = arith.constant 0 : index
    %c0_1 = arith.constant 0 : index
    %0 = vector.load %arg2[%c0, %c0_0, %c0_1] : memref<1x32x256xf32, #tpu.memory_space<vmem>>, vector<1x32x256xf32>
    %1 = vector.shape_cast %0 : vector<1x32x256xf32> to vector<32x256xf32>
    %c0_2 = arith.constant 0 : index
    %c0_3 = arith.constant 0 : index
    %2 = vector.load %arg3[%c0_2, %c0_3] : memref<8x32xf32, #tpu.memory_space<vmem>>, vector<8x32xf32>
    %cst = arith.constant dense<0.000000e+00> : vector<8x256xf32>
    %3 = tpu.matmul %2, %1, %cst {dimension_numbers = #tpu.dot_dimension_numbers<[1], [0], [0], [1], [0, 0, 1, 1], [], []>} : vector<8x32xf32>, vector<32x256xf32>, vector<8x256xf32> -> vector<8x256xf32>
    %cst_4 = arith.constant dense<0xFF800000> : vector<256xf32>
    %4 = vector.multi_reduction <maximumf>, %3, %cst_4 [0] : vector<8x256xf32> to vector<256xf32>
    %5 = vector.shape_cast %4 : vector<256xf32> to vector<1x256xf32>
    %6 = tpu.iota {dimensions = array<i32: 0>} : vector<8x256xi32>
    %7 = vector.broadcast %5 : vector<1x256xf32> to vector<8x256xf32>
    %8 = arith.cmpf oge, %3, %7 : vector<8x256xf32>
    %c8_i32 = arith.constant 8 : i32
    %9 = vector.broadcast %c8_i32 : i32 to vector<8x256xi32>
    %10 = arith.select %8, %6, %9 : vector<8x256xi1>, vector<8x256xi32>
    %cst_5 = arith.constant dense<2147483647> : vector<256xi32>
    %11 = vector.multi_reduction <minsi>, %10, %cst_5 [0] : vector<8x256xi32> to vector<256xi32>
    %12 = vector.shape_cast %11 : vector<256xi32> to vector<1x256xi32>
    %13 = vector.broadcast %12 : vector<1x256xi32> to vector<8x256xi32>
    %14 = arith.cmpi eq, %6, %13 : vector<8x256xi32>
    %15 = arith.extui %14 : vector<8x256xi1> to vector<8x256xi32>
    %16 = arith.sitofp %15 : vector<8x256xi32> to vector<8x256xf32>
    %17 = arith.truncf %16 : vector<8x256xf32> to vector<8x256xbf16>
    %c0_6 = arith.constant 0 : index
    %c0_7 = arith.constant 0 : index
    %c0_8 = arith.constant 0 : index
    %18 = vector.load %arg4[%c0_6, %c0_7, %c0_8] : memref<1x8x256xbf16, #tpu.memory_space<vmem>>, vector<1x8x256xbf16>
    %19 = vector.shape_cast %18 : vector<1x8x256xbf16> to vector<8x256xbf16>
    %20 = vector.shape_cast %17 : vector<8x256xbf16> to vector<1x8x256xbf16>
    tpu.vector_store %arg4[%c0_6, %c0_7, %c0_8], %20 {strides = array<i32>} : memref<1x8x256xbf16, #tpu.memory_space<vmem>>, vector<1x8x256xbf16>,
    return
  }
  func.func @transform_0(%arg0: i32, %arg1: i32) -> (i32, i32, i32) {
    %c0_i32 = arith.constant 0 : i32
    %c0_i32_0 = arith.constant 0 : i32
    return %arg0, %c0_i32, %arg1 : i32, i32, i32
  }
  func.func @transform_1(%arg0: i32, %arg1: i32) -> (i32, i32) {
    %c0_i32 = arith.constant 0 : i32
    %c0_i32_0 = arith.constant 0 : i32
    %c0_i32_1 = arith.constant 0 : i32
    return %c0_i32, %c0_i32_0 : i32, i32
  }
  func.func @transform_2(%arg0: i32, %arg1: i32) -> (i32, i32, i32) {
    %c0_i32 = arith.constant 0 : i32
    %c0_i32_0 = arith.constant 0 : i32
    return %arg0, %c0_i32, %arg1 : i32, i32, i32
  }
}

</mosaic_0001>

<bundles_post_ra>
// kernel: tpu_custom_call.1
= control target key start
LH: loop header
LB: loop body
LE: loop exit
PB: predicated region body
PF: predicated region fallthrough
CT: control target
= control target key end

     0   :  { %7 = vsyncpa [#allocation3], 0  ;;  %s869_s0 = inlined_call_operand.hbm [shape: f32[2,32,256], index: 0, kind: input, shape index: {}]   ;;  %s870_s1 = inlined_call_operand.hbm [shape: f32[8,32], index: 1, kind: input, shape index: {}]   ;;  %s871_s2 = inlined_call_operand.hbm [shape: bf16[2,8,256], index: 2, kind: output, shape index: {}]  }
   0x1   :  { %9 = vsyncpa [#allocation3 + $0x1], 0 }
   0x2   :  { %10 = vsyncpa [#allocation6], 0 }
   0x3   :  { %11 = vsyncpa [#allocation4], 0 }
   0x4   :  { %13 = vsyncpa [#allocation4 + $0x1], 0  ;;  %s702_s9 = smov 0   ;;  %s704_s10 = smov 0  }
   0x5   :  { %s706_s11 = smov 0   ;;  %s708_s12 = smov 0  }
   0x6   :  { %s710_s13 = smov 0   ;;  %s712_s14 = smov 0  }
   0x7 LB: > { %s441_s15 = sadd.s32 4294967295, %s679_s14   ;;  %s442_s16 = sadd.s32 4294967294, %s679_s14   ;;  %s679_s14 = sphi %s712_s14, %s19_s14   ;;  %s675_s13 = sphi %s710_s13, %s890_s13   ;;  %s671_s12 = sphi %s708_s12, %s889_s12   ;;  %s667_s11 = sphi %s706_s11, %s888_s11   ;;  %s663_s10 = sphi %s704_s10, %s887_s10   ;;  %s659_s9 = sphi %s702_s9, %s886_s9  }
   0x8   : > { %s40_s17 = sadd.s32 1, %s667_s11  ;;  %p47_p0 = scmp.ne.s32.totalorder %s667_s11, %s663_s10 }
   0x9   : > { %p48_p1 = scmp.eq.s32.totalorder %s679_s14, 0  ;;  %p53_p2 = scmp.ne.s32.totalorder %s663_s10, %s659_s9 }
   0xa   : > { %p740_p3 = scmp.eq.s32.totalorder %s441_s15, 0  ;;  %p100_p4 = scmp.eq.s32.totalorder %s441_s15, 1 }
   0xb   : > { %p744_p5 = por %p48_p1, %p47_p0  ;;  %p106_p6 = scmp.eq.s32.totalorder %s442_s16, 1 }
   0xc   : > { %p750_p7 = por %p740_p3, %p53_p2  ;;  %p754_p8 = por %p100_p4, %p47_p0 }
   0xd   : > { %p758_p9 = por %p106_p6, %p53_p2  ;;  %p443_p10 = scmp.ge.s32.totalorder %s679_s14, 1 }
   0xe   : > { %s876_s20 = scalar_select %p750_p7, 1, 0 }
   0xf   : > { %s877_s21 = scalar_select %p754_p8, 1, 0 }
  0x10   : > { %s878_s22 = scalar_select %p758_p9, 1, 0 }
  0x11   : > { %p113_p11 = scmp.lt.s32.totalorder %s679_s14, 3  ;;  %s681_s24 = smov [#allocation5]  }
  0x12   : > { %s126_s25 = sshll.u32 %s681_s24, 4  ;;  %p486_p1 = scmp.lt.s32.totalorder %s679_s14, 2  ;;  %s127_s25 = int_to_ptr.vmem [resolvable:$true] %s126_s25 }
  0x13   : > { %p765_p13 = pnand %p443_p10, %p113_p11  ;;  %s31_s28 = sadd.s32 1, %s675_s13 }
  0x14   : > { %p774_p4 = pnand %p486_p1, %p744_p5  ;;  %p33_p6 = scmp.ge.s32.totalorder %s31_s28, 2 }
  0x15   : > { %p473_p0 = pneg %p765_p13  ;;  %s137_s29 = sand.u32 1, %s667_s11  }
  0x16   : > { %s552_s30 = scalar_lea.vmem %s127_s25, 128  ;;  %p560_p8 = scmp.lt.s32.totalorder %s127_s25, %s127_s25 }
  0x17   : > { %p780_p2 = pnand %p473_p0, %p740_p3  ;;  %p553_p11 = scmp.ne.s32.totalorder %s127_s25, %s552_s30 }
  0x18   : > { %p561_p5 = scmp.lt.s32.totalorder %s552_s30, %s552_s30 }
  0x19   : > { %p543_p10 = pneg %p780_p2 }
  0x1a   : > { %p562_p1 = por %p561_p5, %p560_p8 }
  0x1b   : > { %p555_p12 = pnand %p553_p11, %p543_p10 }
  0x1d   : > { %p556_p9 = pneg %p555_p12 }
  0x1f   : > { %p563_p7 = pnand %p562_p1, %p556_p9 }
  0x21   : > { %566 = shalt.err (!%p563_p7)
}
  0x22   : > { %476 = dma.hbm_to_vmem [thread:$0]  (!%p780_p2), %s870_s1, 128, %s127_s25, [#allocation6]  }
  0x23   : > { %s892_s28 = smov (%p33_p6, %s31_s28), 0  ;;  %s446_s5 = sshll.u32 %s137_s29, 6 }
  0x24   : > { %s35_s6 = ssub.s32 %s675_s13, %s892_s28  ;;  %s462_s7 = sshll.u32 %s675_s13, 10 }
  0x25   : > { %p38_p12 = scmp.eq.s32.totalorder %s35_s6, 0  ;;  %s149_s16 = scalar_lea.hbm %s869_s0, %s462_s7 }
  0x26   : > { %s141_s19 = scalar_lea.vmem [#allocation2], %s446_s5  ;;  %s138_s30 = scalar_lea.sflag [#allocation3], %s137_s29 }
  0x27   : > { %s150_s24 = sshll.u32 %s141_s19, 4  ;;  %p569_p7 = pneg %p774_p4  ;;  %s151_s24 = int_to_ptr.vmem [resolvable:$true] %s150_s24 }
  0x28   : > { %s804_s27 = scalar_select %p38_p12, %s667_s11, %s40_s17  }
  0x29   : > { %s580_s25 = scalar_lea.vmem %s151_s24, 1024  ;;  %s682_s3 = smov [#allocation2]  }
  0x2a   : > { %p581_p8 = scmp.ne.s32.totalorder %s151_s24, %s580_s25  ;;  %s585_s4 = sshll.u32 %s682_s3, 4  ;;  %s586_s4 = int_to_ptr.vmem [resolvable:$false] %s585_s4 }
  0x2b   : > { %s587_s6 = scalar_lea.vmem %s586_s4, 2048  ;;  %p588_p2 = scmp.lt.s32.totalorder %s151_s24, %s586_s4 }
  0x2c   : > { %p583_p9 = pnand %p581_p8, %p569_p7  ;;  %p589_p6 = scmp.lt.s32.totalorder %s587_s6, %s580_s25 }
  0x2e   : > { %p584_p0 = pneg %p583_p9  ;;  %p590_p10 = por %p589_p6, %p588_p2 }
  0x30   : > { %p591_p11 = pnand %p590_p10, %p584_p0 }
  0x32   : > { %594 = shalt.err (!%p591_p11)
}
  0x33   : > { %s683_s5 = smov 256   ;;  %s684_s17 = smov 16  }
  0x34   : > { %480 = dma.hbm_to_vmem [thread:$0]  (!%p774_p4), %s149_s16, 1024, %s151_s24, %s138_s30, %s683_s5, %s683_s5, %s684_s17  }
  0x35   : > { %162 = sbr.rel (%p765_p13) target bundleno = 308 (0x134), region = 28  ;;  %s813_s29 = sand.u32 (!%p765_p13), 1, %s663_s10  }
  0x36   : > { %s450_s7 = sshll.u32 (!%p765_p13), %s813_s29, 6  ;;  %s165_s8 = scalar_lea.sflag (!%p765_p13), [#allocation3], %s813_s29 }
  0x37   : > { %s168_s15 = scalar_lea.vmem (!%p765_p13), [#allocation2], %s450_s7  ;;  %p882_p5 = scmp.ne.s32.totalorder (!%p765_p13), %s876_s20, 0 }
  0x3a   : > { %646 = dma.done.wait (%p882_p5), %s165_s8, 1024  }
  0x3b   : > { %648 = vsyncadd (%p882_p5), %s165_s8, 4294966272 }
  0x3c   : > { %650 = dma.done.wait (%p740_p3), [#allocation6], 128  }
  0x3d   : > { %652 = vsyncadd (%p740_p3), [#allocation6], 4294967168  ;;  %v685_v0 = vmov 0.0   ;;  %v202_v1 = vld [vmem:[%s168_s15 + $0x38] sm:$0xff]  ;;  %v201_v2 = vld [vmem:[%s168_s15 + $0x30] sm:$0xff]  ;;  %vm204_vm0 = vcmask 261120   ;;  %v291_v17 = vlaneseq }
  0x3e   : > { %272 = vmatprep.mubr.f32.mxu0 %v685_v0  ;;  %v200_v3 = vld [vmem:[%s168_s15 + $0x28] sm:$0xff]  ;;  %232 = vmatprep.subr.mxu0 %v202_v1  ;;  %v199_v4 = vld [vmem:[%s168_s15 + $0x20] sm:$0xff]  ;;  %v198_v5 = vld [vmem:[%s168_s15 + $0x18] sm:$0xff]  ;;  %s452_s18 = sshll.u32 %s813_s29, 3  ;;  %s464_s20 = sshll.u32 %s671_s12, 7 }
  0x3f   : > { %233 = vmatpush1.msra.mxu0 %v201_v2  ;;  %v197_v6 = vld [vmem:[%s168_s15 + $0x10] sm:$0xff]  ;;  %v196_v7 = vld [vmem:[%s168_s15 + $0x8] sm:$0xff]  ;;  %v195_v8 = vld [vmem:[%s168_s15] sm:$0xff]  ;;  %v292_v22 = vshrl.u32 %v291_v17, 7  ;;  %s192_s23 = scalar_lea.vmem [#allocation7], %s452_s18  ;;  %s345_s24 = scalar_lea.hbm %s871_s2, %s464_s20 }
  0x40   : > { %234 = vmatprep.subr.mxu0 %v200_v3  ;;  %v203_v9 = vld [vmem:[#allocation5] sm:$0xff]  ;;  %s347_s26 = sshll.u32 %s192_s23, 4  ;;  %s331_s30 = scalar_lea.sflag [#allocation4], %s813_s29  ;;  %s348_s26 = int_to_ptr.vmem [resolvable:$true] %s347_s26 }
  0x41   : > { %235 = vmatpush1.msra.mxu0 %v199_v4  ;;  %s595_s25 = scalar_lea.vmem %s348_s26, 128  ;;  %p883_p13 = scmp.ne.s32.totalorder %s877_s21, 0 }
  0x42   : > { %236 = vmatprep.subr.mxu0 %v198_v5  ;;  %p596_p3 = scmp.ne.s32.totalorder %s348_s26, %s595_s25  ;;  %s686_s12 = smov [#allocation7]  }
  0x43   : > { %237 = vmatpush1.msra.mxu0 %v197_v6  ;;  %s599_s3 = sshll.u32 %s686_s12, 4  ;;  %s600_s3 = int_to_ptr.vmem [resolvable:$false] %s599_s3 }
  0x44   : > { %238 = vmatprep.subr.mxu0 %v196_v7  ;;  %p597_p4 = pnand %p596_p3, %p883_p13  ;;  %s601_s4 = scalar_lea.vmem %s600_s3, 256 }
  0x45   : > { %239 = vmatpush1.msra.mxu0 %v195_v8  ;;  %p602_p12 = scmp.lt.s32.totalorder %s348_s26, %s600_s3  ;;  %p603_p7 = scmp.lt.s32.totalorder %s601_s4, %s595_s25 }
  0x46   : > { %453 = vmatmul.mubr.msk.f32.vlgmr.msra.gmra.mxu0 %vm204_vm0, %v203_v9  ;;  %p598_p1 = pneg %p597_p4 }
  0x47   : > { %p604_p8 = por %p603_p7, %p602_p12 }
  0x49   : > { %p605_p9 = pnand %p604_p8, %p598_p1 }
 0x106   : > { %v274_v10 = vpop.f32.mrf.mxu0 }
 0x107   : > { %v279_v11 = vrot.slane %v274_v10, 4 }
 0x108   : > { %v276_v12 = vpop.f32.mrf.mxu0 }
 0x109   : > { %v280_v13 = vmax.f32 %v274_v10, %v279_v11  ;;  %v285_v14 = vrot.slane %v276_v12, 4 }
 0x10b   : > { %v281_v15 = vrot.slane %v280_v13, 2  ;;  %v286_v16 = vmax.f32 %v276_v12, %v285_v14 }
 0x10d   : > { %v282_v18 = vmax.f32 %v280_v13, %v281_v15  ;;  %v287_v19 = vrot.slane %v286_v16, 2 }
 0x10f   : > { %v283_v20 = vrot.slane %v282_v18, 1  ;;  %v288_v21 = vmax.f32 %v286_v16, %v287_v19 }
 0x111   : > { %v284_v23 = vmax.f32 %v282_v18, %v283_v20  ;;  %v289_v24 = vrot.slane %v288_v21, 1 }
 0x113   : > { %vm293_vm1 = vcmp.ge.f32.partialorder %v274_v10, %v284_v23  ;;  %v290_v25 = vmax.f32 %v288_v21, %v289_v24 }
 0x114   : > { %v295_v26 = vsel %vm293_vm1, %v292_v22, 8 }
 0x115   : > { %v297_v27 = vrot.slane %v295_v26, 4  ;;  %vm294_vm2 = vcmp.ge.f32.partialorder %v276_v12, %v290_v25 }
 0x116   : > { %v296_v28 = vsel %vm294_vm2, %v292_v22, 8 }
 0x117   : > { %vm298_vm3 = vcmp.lt.s32.totalorder %v295_v26, %v297_v27  ;;  %v306_v29 = vrot.slane %v296_v28, 4 }
 0x118   : > { %v299_v30 = vsel %vm298_vm3, %v295_v26, %v297_v27 }
 0x119   : > { %v300_v31 = vrot.slane %v299_v30, 2  ;;  %vm307_vm4 = vcmp.lt.s32.totalorder %v296_v28, %v306_v29 }
 0x11a   : > { %v308_v32 = vsel %vm307_vm4, %v296_v28, %v306_v29 }
 0x11b   : > { %vm301_vm5 = vcmp.lt.s32.totalorder %v299_v30, %v300_v31  ;;  %v309_v33 = vrot.slane %v308_v32, 2 }
 0x11c   : > { %v302_v34 = vsel %vm301_vm5, %v299_v30, %v300_v31 }
 0x11d   : > { %v303_v35 = vrot.slane %v302_v34, 1  ;;  %vm310_vm6 = vcmp.lt.s32.totalorder %v308_v32, %v309_v33 }
 0x11e   : > { %v311_v36 = vsel %vm310_vm6, %v308_v32, %v309_v33 }
 0x11f   : > { %vm304_vm7 = vcmp.lt.s32.totalorder %v302_v34, %v303_v35  ;;  %v312_v37 = vrot.slane %v311_v36, 1 }
 0x120   : > { %v305_v38 = vsel %vm304_vm7, %v302_v34, %v303_v35 }
 0x121   : > { %vm313_vm8 = vcmp.lt.s32.totalorder %v311_v36, %v312_v37  ;;  %vm315_vm9 = vcmp.eq.s32.totalorder %v292_v22, %v305_v38 }
 0x122   : > { %v314_v39 = vsel %vm313_vm8, %v311_v36, %v312_v37  ;;  %v454_v40 = vsel %vm315_vm9, 1.0, %v685_v0 }
 0x123   : > { %vm316_vm10 = vcmp.eq.s32.totalorder %v292_v22, %v314_v39 }
 0x124   : > { %v455_v41 = vsel %vm316_vm10, 1.0, %v685_v0 }
 0x125   : > { %v463_v42 = vpack.c.bf16 %v455_v41, %v454_v40 }
 0x127   : > { %329 = vst [vmem:[%s192_s23] sm:$0xff] %v463_v42 }
 0x128   : > { %608 = shalt.err (!%p605_p9)
}
 0x129   : > { %s609_s6 = scalar_lea.hbm %s345_s24, 128  ;;  %s613_s29 = scalar_lea.hbm %s871_s2, 256 }
 0x12a   : > { %p610_p0 = scmp.ne.s32.totalorder %s345_s24, %s609_s6  ;;  %p614_p10 = scmp.lt.s32.totalorder %s345_s24, %s871_s2 }
 0x12b   : > { %p615_p11 = scmp.lt.s32.totalorder %s613_s29, %s609_s6 }
 0x12c   : > { %p611_p2 = pnand %p610_p0, %p883_p13 }
 0x12d   : > { %p616_p5 = por %p615_p11, %p614_p10 }
 0x12e   : > { %p612_p6 = pneg %p611_p2 }
 0x130   : > { %p617_p3 = pnand %p616_p5, %p612_p6 }
 0x132   : > { %620 = shalt.err (!%p617_p3)
}
 0x133   : > { %471 = dma.vmem_to_hbm [thread:$0]  (%p883_p13), %s348_s26, 128, %s345_s24, %s331_s30  }
 0x134 PF: > { %s359_s15 = sand.u32 1, %s659_s9   ;;  %p884_p4 = scmp.ne.s32.totalorder %s878_s22, 0 }
 0x135   : > { %p885_p1 = scmp.ge.s32.totalorder %s679_s14, 2  ;;  %s360_s18 = scalar_lea.sflag [#allocation4], %s359_s15 }
 0x137   : > { %p482_p12 = pnand %p885_p1, %p884_p4 }
 0x139   : > { %p483_p7 = pneg %p482_p12 }
 0x13b   : > { %654 = dma.done.wait (%p483_p7), %s360_s18, 128  }
 0x13c   : > { %656 = vsyncadd (%p483_p7), %s360_s18, 4294967168  ;;  %s19_s14 = sadd.s32 1, %s679_s14   ;;  %s886_s9 = smov %s663_s10 }
 0x13d   : > { %p16_p8 = scmp.ge.s32.totalorder %s19_s14, 4   ;;  %s887_s10 = smov %s667_s11 }
 0x13e   : > { %s888_s11 = smov %s804_s27  ;;  %s889_s12 = smov %s675_s13 }
 0x13f   : > { %s890_s13 = smov %s892_s28  ;;  %18 = sbr.rel (!%p16_p8) target bundleno = 7 (0x7), region = 77 }
 0x144   :  { %365 = vsyncpa [#allocation3], 1 }
 0x145   :  { %367 = vsyncpa [#allocation3 + $0x1], 1 }
 0x146   :  { %368 = vsyncpa [#allocation6], 1 }
 0x147   :  { %369 = vsyncpa [#allocation4], 1 }
 0x148   :  { %371 = vsyncpa [#allocation4 + $0x1], 1 }

</bundles_post_ra>
